<compile_context>
chip_gen: v7x
topology: tpu7x:2x2x1
jax: 0.10.0
libtpu: 0.0.40
codegen_flags: <defaults>
</compile_context>

<pallas_src>
import functools

import jax
import jax.numpy as jnp
from jax import lax
from jax.experimental import pallas as pl
from jax.experimental.pallas import tpu as pltpu

EPS = 1e-5
H1 = 128
H2 = 64
_VMEM_LIMIT = 32 * 1024 * 1024  # explicit scoped-VMEM budget (safe on v5e/v6e/v7x)


def _round_up(n, m):
    return ((n + m - 1) // m) * m


# ---------------------------------------------------------------------------
# in-kernel helpers
# ---------------------------------------------------------------------------
def _linear_relu(x, w_ref, b_ref):
    """relu(x @ W + b); MXU accumulates in f32, elementwise math stays f32."""
    h = jnp.dot(x.astype(w_ref.dtype), w_ref[...],
                preferred_element_type=jnp.float32)
    return jnp.maximum(h + b_ref[...], 0.0)


def _row_mask(tile_rows, batch):
    """(tile_rows, 1) bool mask selecting rows of the real (unpadded) batch."""
    row = lax.broadcasted_iota(jnp.int32, (tile_rows, 1), 0)
    row = row + pl.program_id(0) * tile_rows
    return row < batch


# ---------------------------------------------------------------------------
# kernels
# ---------------------------------------------------------------------------
def _stats1_kernel(x_ref, w1_ref, b1_ref, sum_ref, sumsq_ref, *, batch):
    @pl.when(pl.program_id(0) == 0)
    def _init():
        sum_ref[...] = jnp.zeros_like(sum_ref)
        sumsq_ref[...] = jnp.zeros_like(sumsq_ref)

    h1 = _linear_relu(x_ref[...], w1_ref, b1_ref)
    h1 = jnp.where(_row_mask(x_ref.shape[0], batch), h1, 0.0)
    sum_ref[...] += jnp.sum(h1, axis=0, keepdims=True)
    sumsq_ref[...] += jnp.sum(h1 * h1, axis=0, keepdims=True)


def _stats2_kernel(x_ref, w1_ref, b1_ref, sc1_ref, sh1_ref, w2_ref, b2_ref,
                   sum_ref, sumsq_ref, *, batch):
    @pl.when(pl.program_id(0) == 0)
    def _init():
        sum_ref[...] = jnp.zeros_like(sum_ref)
        sumsq_ref[...] = jnp.zeros_like(sumsq_ref)

    h1 = _linear_relu(x_ref[...], w1_ref, b1_ref)
    h1 = h1 * sc1_ref[...] + sh1_ref[...]            # folded BatchNorm1d(128)
    h2 = _linear_relu(h1, w2_ref, b2_ref)
    h2 = jnp.where(_row_mask(x_ref.shape[0], batch), h2, 0.0)
    sum_ref[...] += jnp.sum(h2, axis=0, keepdims=True)
    sumsq_ref[...] += jnp.sum(h2 * h2, axis=0, keepdims=True)


def _output_kernel(x_ref, w1_ref, b1_ref, sc1_ref, sh1_ref,
                   w2_ref, b2_ref, sc2_ref, sh2_ref,
                   w3t_ref, b3_ref, out_ref):
    h1 = _linear_relu(x_ref[...], w1_ref, b1_ref)
    h1 = h1 * sc1_ref[...] + sh1_ref[...]            # folded BatchNorm1d(128)
    h2 = _linear_relu(h1, w2_ref, b2_ref)
    h2 = h2 * sc2_ref[...] + sh2_ref[...]            # folded BatchNorm1d(64)

    # Last layer as (1, H2) . (TB, H2)^T -> (1, TB): lane-dense logits row
    # (avoids a 1-lane output column and masked partial stores).
    logits = lax.dot_general(
        w3t_ref[...], h2,
        dimension_numbers=(((1,), (1,)), ((), ())),
        preferred_element_type=jnp.float32) + b3_ref[...]

    # Sigmoid: exp on the EUP + exact reciprocal.
    sig = pl.reciprocal(1.0 + jnp.exp(-logits), approx=False)
    out_ref[...] = sig[None]                         # (1, 1, TB) output block


# ---------------------------------------------------------------------------
# wrapper
# ---------------------------------------------------------------------------
def _folded_bn(s, ss, gamma, beta, batch):
    """Turn accumulated [sum, sumsq] into per-feature f32 scale / shift."""
    mean = s / batch
    var = jnp.maximum(ss / batch - mean * mean, 0.0)   # biased variance
    scale = gamma * lax.rsqrt(var + EPS)
    shift = beta - mean * scale
    return scale, shift


def _resident(arr):
    """Small 2-D parameter kept VMEM-resident across all batch tiles."""
    return pl.BlockSpec(arr.shape, lambda t: (0, 0))


def _cost(flops, transcendentals, arrays, extra_bytes):
    n = extra_bytes + sum(int(a.size) * a.dtype.itemsize for a in arrays)
    return pl.CostEstimate(flops=int(flops), transcendentals=int(transcendentals),
                           bytes_accessed=int(n))


@functools.partial(jax.jit, static_argnames=("tile_rows_max", "use_bf16_inputs"))
def fraudnet_forward(x, params, *, tile_rows_max=4096, use_bf16_inputs=False):
    """x: [B, input_dim]. params: dict from init_params(). Returns [B, 1] f32."""
    B, D = x.shape
    f32 = jnp.float32

    # ---- batch tiling: balanced tiles, multiple of 8 sublane rows ----------
    num_tiles = pl.cdiv(B, tile_rows_max)
    tb = _round_up(pl.cdiv(B, num_tiles), 8)
    b_pad = _round_up(B, tb)
    num_tiles = b_pad // tb

    x = x.astype(f32)
    if b_pad != B:
        x = jnp.pad(x, ((0, b_pad - B), (0, 0)))     # padded rows are masked

    w1, b1 = params["w1"], params["b1"]
    w2, b2 = params["w2"], params["b2"]
    w3t = params["w3"].T.astype(f32)                 # (1, 64), stays f32
    b3 = params["b3"].astype(f32)                    # (1, 1)

    if use_bf16_inputs:                              # halve HBM traffic of the
        x = x.astype(jnp.bfloat16)                   # only large operand; MXU
        w1 = w1.astype(jnp.bfloat16)                 # still accumulates in f32
        w2 = w2.astype(jnp.bfloat16)

    x_spec = pl.BlockSpec((tb, D), lambda t: (t, 0))
    x_bytes = b_pad * D * x.dtype.itemsize

    arb = pltpu.CompilerParams(dimension_semantics=("arbitrary",),
                               vmem_limit_bytes=_VMEM_LIMIT)
    par = pltpu.CompilerParams(dimension_semantics=("parallel",),
                               vmem_limit_bytes=_VMEM_LIMIT)

    # ---- pass 1: full-batch statistics of h1 -------------------------------
    sum1, sumsq1 = pl.pallas_call(
        functools.partial(_stats1_kernel, batch=B),
        out_shape=(jax.ShapeDtypeStruct((1, H1), f32),
                   jax.ShapeDtypeStruct((1, H1), f32)),
        grid=(num_tiles,),
        in_specs=[x_spec, _resident(w1), _resident(b1)],
        out_specs=(pl.BlockSpec((1, H1), lambda t: (0, 0)),
                   pl.BlockSpec((1, H1), lambda t: (0, 0))),
        compiler_params=arb,
        cost_estimate=_cost(2 * b_pad * D * H1 + 4 * b_pad * H1, 0,
                            (w1, b1), x_bytes + 2 * H1 * 4),
    )(x, w1, b1)
    sc1, sh1 = _folded_bn(sum1, sumsq1, params["g1"], params["be1"], B)

    # ---- pass 2: full-batch statistics of h2 -------------------------------
    sum2, sumsq2 = pl.pallas_call(
        functools.partial(_stats2_kernel, batch=B),
        out_shape=(jax.ShapeDtypeStruct((1, H2), f32),
                   jax.ShapeDtypeStruct((1, H2), f32)),
        grid=(num_tiles,),
        in_specs=[x_spec, _resident(w1), _resident(b1), _resident(sc1),
                  _resident(sh1), _resident(w2), _resident(b2)],
        out_specs=(pl.BlockSpec((1, H2), lambda t: (0, 0)),
                   pl.BlockSpec((1, H2), lambda t: (0, 0))),
        compiler_params=arb,
        cost_estimate=_cost(2 * b_pad * (D * H1 + H1 * H2) + 6 * b_pad * (H1 + H2),
                            0, (w1, b1, sc1, sh1, w2, b2), x_bytes + 2 * H2 * 4),
    )(x, w1, b1, sc1, sh1, w2, b2)
    sc2, sh2 = _folded_bn(sum2, sumsq2, params["g2"], params["be2"], B)

    # ---- pass 3: normalized forward + sigmoid, lane-dense output -----------
    out = pl.pallas_call(
        _output_kernel,
        out_shape=jax.ShapeDtypeStruct((num_tiles, 1, tb), f32),
        grid=(num_tiles,),
        in_specs=[x_spec, _resident(w1), _resident(b1), _resident(sc1),
                  _resident(sh1), _resident(w2), _resident(b2), _resident(sc2),
                  _resident(sh2), _resident(w3t), _resident(b3)],
        out_specs=pl.BlockSpec((1, 1, tb), lambda t: (t, 0, 0)),
        compiler_params=par,
        cost_estimate=_cost(2 * b_pad * (D * H1 + H1 * H2 + H2)
                            + 6 * b_pad * (H1 + H2), b_pad,
                            (w1, b1, sc1, sh1, w2, b2, sc2, sh2, w3t, b3),
                            x_bytes + b_pad * 4),
    )(x, w1, b1, sc1, sh1, w2, b2, sc2, sh2, w3t, b3)

    return out.reshape(b_pad, 1)[:B]


# ---------------------------------------------------------------------------
# parameters + pure-JAX reference (PyTorch-equivalent shapes / semantics)
# ---------------------------------------------------------------------------
def init_params(input_dim, key):
    ks = jax.random.split(key, 6)

    def linear_init(kw, kb, fan_in, fan_out):
        bound = 1.0 / jnp.sqrt(fan_in)
        w = jax.random.uniform(kw, (fan_in, fan_out), jnp.float32, -bound, bound)
        b = jax.random.uniform(kb, (1, fan_out), jnp.float32, -bound, bound)
        return w, b

    w1, b1 = linear_init(ks[0], ks[1], input_dim, H1)
    w2, b2 = linear_init(ks[2], ks[3], H1, H2)
    w3, b3 = linear_init(ks[4], ks[5], H2, 1)
    return dict(
        w1=w1, b1=b1,
        g1=jnp.ones((1, H1), jnp.float32), be1=jnp.zeros((1, H1), jnp.float32),
        w2=w2, b2=b2,
        g2=jnp.ones((1, H2), jnp.float32), be2=jnp.zeros((1, H2), jnp.float32),
        w3=w3, b3=b3,
    )


def fraudnet_reference(x, p):
    h1 = jnp.maximum(x @ p["w1"] + p["b1"], 0.0)
    m1 = h1.mean(0, keepdims=True)
    v1 = ((h1 - m1) ** 2).mean(0, keepdims=True)
    h1 = (h1 - m1) / jnp.sqrt(v1 + EPS) * p["g1"] + p["be1"]
    h2 = jnp.maximum(h1 @ p["w2"] + p["b2"], 0.0)
    m2 = h2.mean(0, keepdims=True)
    v2 = ((h2 - m2) ** 2).mean(0, keepdims=True)
    h2 = (h2 - m2) / jnp.sqrt(v2 + EPS) * p["g2"] + p["be2"]
    return jax.nn.sigmoid(h2 @ p["w3"] + p["b3"])


if __name__ == "__main__":
    B, INPUT_DIM = 8, 32
    key = jax.random.PRNGKey(0)
    k_x, k_p = jax.random.split(key)

    x = jax.random.normal(k_x, (B, INPUT_DIM), jnp.float32)
    params = init_params(INPUT_DIM, k_p)

    # f32 path, single tile.
    out = jax.block_until_ready(fraudnet_forward(x, params))
    ref = fraudnet_reference(x, params)
    assert out.shape == (B, 1)
    assert jnp.allclose(out, ref, atol=1e-5, rtol=1e-5)

    # Multi-tile path (several batch tiles + padded-row masking), still f32.
    B2 = 300
    x2 = jax.random.normal(jax.random.PRNGKey(1), (B2, INPUT_DIM), jnp.float32)
    out2 = jax.block_until_ready(fraudnet_forward(x2, params, tile_rows_max=128))
    ref2 = fraudnet_reference(x2, params)
    assert out2.shape == (B2, 1)
    assert jnp.allclose(out2, ref2, atol=1e-4, rtol=1e-4)

    # bf16 storage for x / W1 / W2 (f32 accumulation + f32 BN math).
    out_bf16 = jax.block_until_ready(
        fraudnet_forward(x, params, use_bf16_inputs=True))
    assert out_bf16.shape == (B, 1)
    assert float(jnp.max(jnp.abs(out_bf16 - ref))) < 5e-2

    print("KERNEL_OK")
</pallas_src>

<mosaic_0001>
module attributes {stable_mosaic.version = 11 : i64} {
  func.func @_stats2_kernel(%arg0: i32, %arg1: memref<8x32xf32, #tpu.memory_space<vmem>>, %arg2: memref<32x128xf32, #tpu.memory_space<vmem>>, %arg3: memref<1x128xf32, #tpu.memory_space<vmem>>, %arg4: memref<1x128xf32, #tpu.memory_space<vmem>>, %arg5: memref<1x128xf32, #tpu.memory_space<vmem>>, %arg6: memref<128x64xf32, #tpu.memory_space<vmem>>, %arg7: memref<1x64xf32, #tpu.memory_space<vmem>>, %arg8: memref<1x64xf32, #tpu.memory_space<vmem>>, %arg9: memref<1x64xf32, #tpu.memory_space<vmem>>) attributes {dimension_semantics = [#tpu.dimension_semantics<arbitrary>], iteration_bounds = array<i64: 1>, scalar_prefetch = 0 : i64, scratch_operands = 0 : i64, tpu.core_type = #tpu.core_type<tc>, window_params = [{transform_indices = @transform_0, window_bounds = array<i64: 8, 32>}, {pipeline_mode = #tpu.pipeline_mode<synchronous>, transform_indices = @transform_1, window_bounds = array<i64: 32, 128>}, {pipeline_mode = #tpu.pipeline_mode<synchronous>, transform_indices = @transform_2, window_bounds = array<i64: 1, 128>}, {pipeline_mode = #tpu.pipeline_mode<synchronous>, transform_indices = @transform_3, window_bounds = array<i64: 1, 128>}, {pipeline_mode = #tpu.pipeline_mode<synchronous>, transform_indices = @transform_4, window_bounds = array<i64: 1, 128>}, {pipeline_mode = #tpu.pipeline_mode<synchronous>, transform_indices = @transform_5, window_bounds = array<i64: 128, 64>}, {pipeline_mode = #tpu.pipeline_mode<synchronous>, transform_indices = @transform_6, window_bounds = array<i64: 1, 64>}, {pipeline_mode = #tpu.pipeline_mode<synchronous>, transform_indices = @transform_7, window_bounds = array<i64: 1, 64>}, {pipeline_mode = #tpu.pipeline_mode<synchronous>, transform_indices = @transform_8, window_bounds = array<i64: 1, 64>}]} {
    %c0_i32 = arith.constant 0 : i32
    %0 = arith.cmpi eq, %arg0, %c0_i32 : i32
    %1 = arith.extui %0 : i1 to i32
    %c0_i32_0 = arith.constant 0 : i32
    %2 = arith.cmpi ne, %1, %c0_i32_0 : i32
    scf.if %2 {
      %cst_29 = arith.constant 0.000000e+00 : f32
      %45 = vector.broadcast %cst_29 : f32 to vector<1x64xf32>
      %c0_30 = arith.constant 0 : index
      %c0_31 = arith.constant 0 : index
      %46 = vector.load %arg8[%c0_30, %c0_31] : memref<1x64xf32, #tpu.memory_space<vmem>>, vector<1x64xf32>
      tpu.vector_store %arg8[%c0_30, %c0_31], %45 {strides = array<i32>} : memref<1x64xf32, #tpu.memory_space<vmem>>, vector<1x64xf32>,
      %cst_32 = arith.constant 0.000000e+00 : f32
      %47 = vector.broadcast %cst_32 : f32 to vector<1x64xf32>
      %c0_33 = arith.constant 0 : index
      %c0_34 = arith.constant 0 : index
      %48 = vector.load %arg9[%c0_33, %c0_34] : memref<1x64xf32, #tpu.memory_space<vmem>>, vector<1x64xf32>
      tpu.vector_store %arg9[%c0_33, %c0_34], %47 {strides = array<i32>} : memref<1x64xf32, #tpu.memory_space<vmem>>, vector<1x64xf32>,
    } else {
    }
    %c0 = arith.constant 0 : index
    %c0_1 = arith.constant 0 : index
    %3 = vector.load %arg1[%c0, %c0_1] : memref<8x32xf32, #tpu.memory_space<vmem>>, vector<8x32xf32>
    %c0_2 = arith.constant 0 : index
    %c0_3 = arith.constant 0 : index
    %4 = vector.load %arg2[%c0_2, %c0_3] : memref<32x128xf32, #tpu.memory_space<vmem>>, vector<32x128xf32>
    %cst = arith.constant dense<0.000000e+00> : vector<8x128xf32>
    %5 = tpu.matmul %3, %4, %cst {dimension_numbers = #tpu.dot_dimension_numbers<[1], [0], [0], [1], [0, 0, 1, 1], [], []>} : vector<8x32xf32>, vector<32x128xf32>, vector<8x128xf32> -> vector<8x128xf32>
    %c0_4 = arith.constant 0 : index
    %c0_5 = arith.constant 0 : index
    %6 = vector.load %arg3[%c0_4, %c0_5] : memref<1x128xf32, #tpu.memory_space<vmem>>, vector<1x128xf32>
    %7 = vector.broadcast %6 : vector<1x128xf32> to vector<8x128xf32>
    %8 = arith.addf %5, %7 : vector<8x128xf32>
    %cst_6 = arith.constant 0.000000e+00 : f32
    %9 = vector.broadcast %cst_6 : f32 to vector<8x128xf32>
    %10 = arith.maximumf %8, %9 : vector<8x128xf32>
    %c0_7 = arith.constant 0 : index
    %c0_8 = arith.constant 0 : index
    %11 = vector.load %arg4[%c0_7, %c0_8] : memref<1x128xf32, #tpu.memory_space<vmem>>, vector<1x128xf32>
    %12 = vector.broadcast %11 : vector<1x128xf32> to vector<8x128xf32>
    %13 = arith.mulf %10, %12 : vector<8x128xf32>
    %c0_9 = arith.constant 0 : index
    %c0_10 = arith.constant 0 : index
    %14 = vector.load %arg5[%c0_9, %c0_10] : memref<1x128xf32, #tpu.memory_space<vmem>>, vector<1x128xf32>
    %15 = vector.broadcast %14 : vector<1x128xf32> to vector<8x128xf32>
    %16 = arith.addf %13, %15 : vector<8x128xf32>
    %c0_11 = arith.constant 0 : index
    %c0_12 = arith.constant 0 : index
    %17 = vector.load %arg6[%c0_11, %c0_12] : memref<128x64xf32, #tpu.memory_space<vmem>>, vector<128x64xf32>
    %cst_13 = arith.constant dense<0.000000e+00> : vector<8x64xf32>
    %18 = tpu.matmul %16, %17, %cst_13 {dimension_numbers = #tpu.dot_dimension_numbers<[1], [0], [0], [1], [0, 0, 1, 1], [], []>} : vector<8x128xf32>, vector<128x64xf32>, vector<8x64xf32> -> vector<8x64xf32>
    %c0_14 = arith.constant 0 : index
    %c0_15 = arith.constant 0 : index
    %19 = vector.load %arg7[%c0_14, %c0_15] : memref<1x64xf32, #tpu.memory_space<vmem>>, vector<1x64xf32>
    %20 = vector.broadcast %19 : vector<1x64xf32> to vector<8x64xf32>
    %21 = arith.addf %18, %20 : vector<8x64xf32>
    %cst_16 = arith.constant 0.000000e+00 : f32
    %22 = vector.broadcast %cst_16 : f32 to vector<8x64xf32>
    %23 = arith.maximumf %21, %22 : vector<8x64xf32>
    %24 = tpu.iota {dimensions = array<i32: 0>} : vector<8x1xi32>
    %c8_i32 = arith.constant 8 : i32
    %25 = arith.muli %arg0, %c8_i32 : i32
    %26 = vector.broadcast %25 : i32 to vector<8x1xi32>
    %27 = arith.addi %24, %26 : vector<8x1xi32>
    %c8_i32_17 = arith.constant 8 : i32
    %28 = vector.broadcast %c8_i32_17 : i32 to vector<8x1xi32>
    %29 = arith.cmpi slt, %27, %28 : vector<8x1xi32>
    %cst_18 = arith.constant 0.000000e+00 : f32
    %30 = vector.shape_cast %29 : vector<8x1xi1> to vector<8x1xi1>
    %31 = vector.broadcast %30 : vector<8x1xi1> to vector<8x64xi1>
    %32 = vector.broadcast %cst_18 : f32 to vector<8x64xf32>
    %33 = arith.select %31, %23, %32 : vector<8x64xi1>, vector<8x64xf32>
    %c0_19 = arith.constant 0 : index
    %c0_20 = arith.constant 0 : index
    %34 = vector.load %arg8[%c0_19, %c0_20] : memref<1x64xf32, #tpu.memory_space<vmem>>, vector<1x64xf32>
    %cst_21 = arith.constant dense<0.000000e+00> : vector<64xf32>
    %35 = vector.multi_reduction <add>, %33, %cst_21 [0] : vector<8x64xf32> to vector<64xf32>
    %36 = vector.shape_cast %35 : vector<64xf32> to vector<1x64xf32>
    %37 = arith.addf %34, %36 : vector<1x64xf32>
    %c0_22 = arith.constant 0 : index
    %c0_23 = arith.constant 0 : index
    %38 = vector.load %arg8[%c0_22, %c0_23] : memref<1x64xf32, #tpu.memory_space<vmem>>, vector<1x64xf32>
    tpu.vector_store %arg8[%c0_22, %c0_23], %37 {strides = array<i32>} : memref<1x64xf32, #tpu.memory_space<vmem>>, vector<1x64xf32>,
    %c0_24 = arith.constant 0 : index
    %c0_25 = arith.constant 0 : index
    %39 = vector.load %arg9[%c0_24, %c0_25] : memref<1x64xf32, #tpu.memory_space<vmem>>, vector<1x64xf32>
    %40 = arith.mulf %33, %33 : vector<8x64xf32>
    %cst_26 = arith.constant dense<0.000000e+00> : vector<64xf32>
    %41 = vector.multi_reduction <add>, %40, %cst_26 [0] : vector<8x64xf32> to vector<64xf32>
    %42 = vector.shape_cast %41 : vector<64xf32> to vector<1x64xf32>
    %43 = arith.addf %39, %42 : vector<1x64xf32>
    %c0_27 = arith.constant 0 : index
    %c0_28 = arith.constant 0 : index
    %44 = vector.load %arg9[%c0_27, %c0_28] : memref<1x64xf32, #tpu.memory_space<vmem>>, vector<1x64xf32>
    tpu.vector_store %arg9[%c0_27, %c0_28], %43 {strides = array<i32>} : memref<1x64xf32, #tpu.memory_space<vmem>>, vector<1x64xf32>,
    return
  }
  func.func @transform_0(%arg0: i32) -> (i32, i32) {
    %c0_i32 = arith.constant 0 : i32
    %c0_i32_0 = arith.constant 0 : i32
    return %arg0, %c0_i32 : i32, i32
  }
  func.func @transform_1(%arg0: i32) -> (i32, i32) {
    %c0_i32 = arith.constant 0 : i32
    %c0_i32_0 = arith.constant 0 : i32
    %c0_i32_1 = arith.constant 0 : i32
    return %c0_i32, %c0_i32_0 : i32, i32
  }
  func.func @transform_2(%arg0: i32) -> (i32, i32) {
    %c0_i32 = arith.constant 0 : i32
    %c0_i32_0 = arith.constant 0 : i32
    %c0_i32_1 = arith.constant 0 : i32
    return %c0_i32, %c0_i32_0 : i32, i32
  }
  func.func @transform_3(%arg0: i32) -> (i32, i32) {
    %c0_i32 = arith.constant 0 : i32
    %c0_i32_0 = arith.constant 0 : i32
    %c0_i32_1 = arith.constant 0 : i32
    return %c0_i32, %c0_i32_0 : i32, i32
  }
  func.func @transform_4(%arg0: i32) -> (i32, i32) {
    %c0_i32 = arith.constant 0 : i32
    %c0_i32_0 = arith.constant 0 : i32
    %c0_i32_1 = arith.constant 0 : i32
    return %c0_i32, %c0_i32_0 : i32, i32
  }
  func.func @transform_5(%arg0: i32) -> (i32, i32) {
    %c0_i32 = arith.constant 0 : i32
    %c0_i32_0 = arith.constant 0 : i32
    %c0_i32_1 = arith.constant 0 : i32
    return %c0_i32, %c0_i32_0 : i32, i32
  }
  func.func @transform_6(%arg0: i32) -> (i32, i32) {
    %c0_i32 = arith.constant 0 : i32
    %c0_i32_0 = arith.constant 0 : i32
    %c0_i32_1 = arith.constant 0 : i32
    return %c0_i32, %c0_i32_0 : i32, i32
  }
  func.func @transform_7(%arg0: i32) -> (i32, i32) {
    %c0_i32 = arith.constant 0 : i32
    %c0_i32_0 = arith.constant 0 : i32
    %c0_i32_1 = arith.constant 0 : i32
    return %c0_i32, %c0_i32_0 : i32, i32
  }
  func.func @transform_8(%arg0: i32) -> (i32, i32) {
    %c0_i32 = arith.constant 0 : i32
    %c0_i32_0 = arith.constant 0 : i32
    %c0_i32_1 = arith.constant 0 : i32
    return %c0_i32, %c0_i32_0 : i32, i32
  }
}

module attributes {stable_mosaic.version = 11 : i64} {
  func.func @_stats1_kernel(%arg0: i32, %arg1: memref<8x32xf32, #tpu.memory_space<vmem>>, %arg2: memref<32x128xf32, #tpu.memory_space<vmem>>, %arg3: memref<1x128xf32, #tpu.memory_space<vmem>>, %arg4: memref<1x128xf32, #tpu.memory_space<vmem>>, %arg5: memref<1x128xf32, #tpu.memory_space<vmem>>) attributes {dimension_semantics = [#tpu.dimension_semantics<arbitrary>], iteration_bounds = array<i64: 1>, scalar_prefetch = 0 : i64, scratch_operands = 0 : i64, tpu.core_type = #tpu.core_type<tc>, window_params = [{transform_indices = @transform_0, window_bounds = array<i64: 8, 32>}, {pipeline_mode = #tpu.pipeline_mode<synchronous>, transform_indices = @transform_1, window_bounds = array<i64: 32, 128>}, {pipeline_mode = #tpu.pipeline_mode<synchronous>, transform_indices = @transform_2, window_bounds = array<i64: 1, 128>}, {pipeline_mode = #tpu.pipeline_mode<synchronous>, transform_indices = @transform_3, window_bounds = array<i64: 1, 128>}, {pipeline_mode = #tpu.pipeline_mode<synchronous>, transform_indices = @transform_4, window_bounds = array<i64: 1, 128>}]} {
    %c0_i32 = arith.constant 0 : i32
    %0 = arith.cmpi eq, %arg0, %c0_i32 : i32
    %1 = arith.extui %0 : i1 to i32
    %c0_i32_0 = arith.constant 0 : i32
    %2 = arith.cmpi ne, %1, %c0_i32_0 : i32
    scf.if %2 {
      %cst_19 = arith.constant 0.000000e+00 : f32
      %32 = vector.broadcast %cst_19 : f32 to vector<1x128xf32>
      %c0_20 = arith.constant 0 : index
      %c0_21 = arith.constant 0 : index
      %33 = vector.load %arg4[%c0_20, %c0_21] : memref<1x128xf32, #tpu.memory_space<vmem>>, vector<1x128xf32>
      tpu.vector_store %arg4[%c0_20, %c0_21], %32 {strides = array<i32>} : memref<1x128xf32, #tpu.memory_space<vmem>>, vector<1x128xf32>,
      %cst_22 = arith.constant 0.000000e+00 : f32
      %34 = vector.broadcast %cst_22 : f32 to vector<1x128xf32>
      %c0_23 = arith.constant 0 : index
      %c0_24 = arith.constant 0 : index
      %35 = vector.load %arg5[%c0_23, %c0_24] : memref<1x128xf32, #tpu.memory_space<vmem>>, vector<1x128xf32>
      tpu.vector_store %arg5[%c0_23, %c0_24], %34 {strides = array<i32>} : memref<1x128xf32, #tpu.memory_space<vmem>>, vector<1x128xf32>,
    } else {
    }
    %c0 = arith.constant 0 : index
    %c0_1 = arith.constant 0 : index
    %3 = vector.load %arg1[%c0, %c0_1] : memref<8x32xf32, #tpu.memory_space<vmem>>, vector<8x32xf32>
    %c0_2 = arith.constant 0 : index
    %c0_3 = arith.constant 0 : index
    %4 = vector.load %arg2[%c0_2, %c0_3] : memref<32x128xf32, #tpu.memory_space<vmem>>, vector<32x128xf32>
    %cst = arith.constant dense<0.000000e+00> : vector<8x128xf32>
    %5 = tpu.matmul %3, %4, %cst {dimension_numbers = #tpu.dot_dimension_numbers<[1], [0], [0], [1], [0, 0, 1, 1], [], []>} : vector<8x32xf32>, vector<32x128xf32>, vector<8x128xf32> -> vector<8x128xf32>
    %c0_4 = arith.constant 0 : index
    %c0_5 = arith.constant 0 : index
    %6 = vector.load %arg3[%c0_4, %c0_5] : memref<1x128xf32, #tpu.memory_space<vmem>>, vector<1x128xf32>
    %7 = vector.broadcast %6 : vector<1x128xf32> to vector<8x128xf32>
    %8 = arith.addf %5, %7 : vector<8x128xf32>
    %cst_6 = arith.constant 0.000000e+00 : f32
    %9 = vector.broadcast %cst_6 : f32 to vector<8x128xf32>
    %10 = arith.maximumf %8, %9 : vector<8x128xf32>
    %11 = tpu.iota {dimensions = array<i32: 0>} : vector<8x1xi32>
    %c8_i32 = arith.constant 8 : i32
    %12 = arith.muli %arg0, %c8_i32 : i32
    %13 = vector.broadcast %12 : i32 to vector<8x1xi32>
    %14 = arith.addi %11, %13 : vector<8x1xi32>
    %c8_i32_7 = arith.constant 8 : i32
    %15 = vector.broadcast %c8_i32_7 : i32 to vector<8x1xi32>
    %16 = arith.cmpi slt, %14, %15 : vector<8x1xi32>
    %cst_8 = arith.constant 0.000000e+00 : f32
    %17 = vector.shape_cast %16 : vector<8x1xi1> to vector<8x1xi1>
    %18 = vector.broadcast %17 : vector<8x1xi1> to vector<8x128xi1>
    %19 = vector.broadcast %cst_8 : f32 to vector<8x128xf32>
    %20 = arith.select %18, %10, %19 : vector<8x128xi1>, vector<8x128xf32>
    %c0_9 = arith.constant 0 : index
    %c0_10 = arith.constant 0 : index
    %21 = vector.load %arg4[%c0_9, %c0_10] : memref<1x128xf32, #tpu.memory_space<vmem>>, vector<1x128xf32>
    %cst_11 = arith.constant dense<0.000000e+00> : vector<128xf32>
    %22 = vector.multi_reduction <add>, %20, %cst_11 [0] : vector<8x128xf32> to vector<128xf32>
    %23 = vector.shape_cast %22 : vector<128xf32> to vector<1x128xf32>
    %24 = arith.addf %21, %23 : vector<1x128xf32>
    %c0_12 = arith.constant 0 : index
    %c0_13 = arith.constant 0 : index
    %25 = vector.load %arg4[%c0_12, %c0_13] : memref<1x128xf32, #tpu.memory_space<vmem>>, vector<1x128xf32>
    tpu.vector_store %arg4[%c0_12, %c0_13], %24 {strides = array<i32>} : memref<1x128xf32, #tpu.memory_space<vmem>>, vector<1x128xf32>,
    %c0_14 = arith.constant 0 : index
    %c0_15 = arith.constant 0 : index
    %26 = vector.load %arg5[%c0_14, %c0_15] : memref<1x128xf32, #tpu.memory_space<vmem>>, vector<1x128xf32>
    %27 = arith.mulf %20, %20 : vector<8x128xf32>
    %cst_16 = arith.constant dense<0.000000e+00> : vector<128xf32>
    %28 = vector.multi_reduction <add>, %27, %cst_16 [0] : vector<8x128xf32> to vector<128xf32>
    %29 = vector.shape_cast %28 : vector<128xf32> to vector<1x128xf32>
    %30 = arith.addf %26, %29 : vector<1x128xf32>
    %c0_17 = arith.constant 0 : index
    %c0_18 = arith.constant 0 : index
    %31 = vector.load %arg5[%c0_17, %c0_18] : memref<1x128xf32, #tpu.memory_space<vmem>>, vector<1x128xf32>
    tpu.vector_store %arg5[%c0_17, %c0_18], %30 {strides = array<i32>} : memref<1x128xf32, #tpu.memory_space<vmem>>, vector<1x128xf32>,
    return
  }
  func.func @transform_0(%arg0: i32) -> (i32, i32) {
    %c0_i32 = arith.constant 0 : i32
    %c0_i32_0 = arith.constant 0 : i32
    return %arg0, %c0_i32 : i32, i32
  }
  func.func @transform_1(%arg0: i32) -> (i32, i32) {
    %c0_i32 = arith.constant 0 : i32
    %c0_i32_0 = arith.constant 0 : i32
    %c0_i32_1 = arith.constant 0 : i32
    return %c0_i32, %c0_i32_0 : i32, i32
  }
  func.func @transform_2(%arg0: i32) -> (i32, i32) {
    %c0_i32 = arith.constant 0 : i32
    %c0_i32_0 = arith.constant 0 : i32
    %c0_i32_1 = arith.constant 0 : i32
    return %c0_i32, %c0_i32_0 : i32, i32
  }
  func.func @transform_3(%arg0: i32) -> (i32, i32) {
    %c0_i32 = arith.constant 0 : i32
    %c0_i32_0 = arith.constant 0 : i32
    %c0_i32_1 = arith.constant 0 : i32
    return %c0_i32, %c0_i32_0 : i32, i32
  }
  func.func @transform_4(%arg0: i32) -> (i32, i32) {
    %c0_i32 = arith.constant 0 : i32
    %c0_i32_0 = arith.constant 0 : i32
    %c0_i32_1 = arith.constant 0 : i32
    return %c0_i32, %c0_i32_0 : i32, i32
  }
}

module attributes {stable_mosaic.version = 11 : i64} {
  func.func @_output_kernel(%arg0: i32, %arg1: memref<8x32xf32, #tpu.memory_space<vmem>>, %arg2: memref<32x128xf32, #tpu.memory_space<vmem>>, %arg3: memref<1x128xf32, #tpu.memory_space<vmem>>, %arg4: memref<1x128xf32, #tpu.memory_space<vmem>>, %arg5: memref<1x128xf32, #tpu.memory_space<vmem>>, %arg6: memref<128x64xf32, #tpu.memory_space<vmem>>, %arg7: memref<1x64xf32, #tpu.memory_space<vmem>>, %arg8: memref<1x64xf32, #tpu.memory_space<vmem>>, %arg9: memref<1x64xf32, #tpu.memory_space<vmem>>, %arg10: memref<1x64xf32, #tpu.memory_space<vmem>>, %arg11: memref<1x1xf32, #tpu.memory_space<vmem>>, %arg12: memref<1x1x8xf32, #tpu.memory_space<vmem>>) attributes {dimension_semantics = [#tpu.dimension_semantics<parallel>], iteration_bounds = array<i64: 1>, scalar_prefetch = 0 : i64, scratch_operands = 0 : i64, tpu.core_type = #tpu.core_type<tc>, window_params = [{transform_indices = @transform_0, window_bounds = array<i64: 8, 32>}, {pipeline_mode = #tpu.pipeline_mode<synchronous>, transform_indices = @transform_1, window_bounds = array<i64: 32, 128>}, {pipeline_mode = #tpu.pipeline_mode<synchronous>, transform_indices = @transform_2, window_bounds = array<i64: 1, 128>}, {pipeline_mode = #tpu.pipeline_mode<synchronous>, transform_indices = @transform_3, window_bounds = array<i64: 1, 128>}, {pipeline_mode = #tpu.pipeline_mode<synchronous>, transform_indices = @transform_4, window_bounds = array<i64: 1, 128>}, {pipeline_mode = #tpu.pipeline_mode<synchronous>, transform_indices = @transform_5, window_bounds = array<i64: 128, 64>}, {pipeline_mode = #tpu.pipeline_mode<synchronous>, transform_indices = @transform_6, window_bounds = array<i64: 1, 64>}, {pipeline_mode = #tpu.pipeline_mode<synchronous>, transform_indices = @transform_7, window_bounds = array<i64: 1, 64>}, {pipeline_mode = #tpu.pipeline_mode<synchronous>, transform_indices = @transform_8, window_bounds = array<i64: 1, 64>}, {pipeline_mode = #tpu.pipeline_mode<synchronous>, transform_indices = @transform_9, window_bounds = array<i64: 1, 64>}, {pipeline_mode = #tpu.pipeline_mode<synchronous>, transform_indices = @transform_10, window_bounds = array<i64: 1, 1>}, {transform_indices = @transform_11, window_bounds = array<i64: 1, 1, 8>}]} {
    %c0 = arith.constant 0 : index
    %c0_0 = arith.constant 0 : index
    %0 = vector.load %arg1[%c0, %c0_0] : memref<8x32xf32, #tpu.memory_space<vmem>>, vector<8x32xf32>
    %c0_1 = arith.constant 0 : index
    %c0_2 = arith.constant 0 : index
    %1 = vector.load %arg2[%c0_1, %c0_2] : memref<32x128xf32, #tpu.memory_space<vmem>>, vector<32x128xf32>
    %cst = arith.constant dense<0.000000e+00> : vector<8x128xf32>
    %2 = tpu.matmul %0, %1, %cst {dimension_numbers = #tpu.dot_dimension_numbers<[1], [0], [0], [1], [0, 0, 1, 1], [], []>} : vector<8x32xf32>, vector<32x128xf32>, vector<8x128xf32> -> vector<8x128xf32>
    %c0_3 = arith.constant 0 : index
    %c0_4 = arith.constant 0 : index
    %3 = vector.load %arg3[%c0_3, %c0_4] : memref<1x128xf32, #tpu.memory_space<vmem>>, vector<1x128xf32>
    %4 = vector.broadcast %3 : vector<1x128xf32> to vector<8x128xf32>
    %5 = arith.addf %2, %4 : vector<8x128xf32>
    %cst_5 = arith.constant 0.000000e+00 : f32
    %6 = vector.broadcast %cst_5 : f32 to vector<8x128xf32>
    %7 = arith.maximumf %5, %6 : vector<8x128xf32>
    %c0_6 = arith.constant 0 : index
    %c0_7 = arith.constant 0 : index
    %8 = vector.load %arg4[%c0_6, %c0_7] : memref<1x128xf32, #tpu.memory_space<vmem>>, vector<1x128xf32>
    %9 = vector.broadcast %8 : vector<1x128xf32> to vector<8x128xf32>
    %10 = arith.mulf %7, %9 : vector<8x128xf32>
    %c0_8 = arith.constant 0 : index
    %c0_9 = arith.constant 0 : index
    %11 = vector.load %arg5[%c0_8, %c0_9] : memref<1x128xf32, #tpu.memory_space<vmem>>, vector<1x128xf32>
    %12 = vector.broadcast %11 : vector<1x128xf32> to vector<8x128xf32>
    %13 = arith.addf %10, %12 : vector<8x128xf32>
    %c0_10 = arith.constant 0 : index
    %c0_11 = arith.constant 0 : index
    %14 = vector.load %arg6[%c0_10, %c0_11] : memref<128x64xf32, #tpu.memory_space<vmem>>, vector<128x64xf32>
    %cst_12 = arith.constant dense<0.000000e+00> : vector<8x64xf32>
    %15 = tpu.matmul %13, %14, %cst_12 {dimension_numbers = #tpu.dot_dimension_numbers<[1], [0], [0], [1], [0, 0, 1, 1], [], []>} : vector<8x128xf32>, vector<128x64xf32>, vector<8x64xf32> -> vector<8x64xf32>
    %c0_13 = arith.constant 0 : index
    %c0_14 = arith.constant 0 : index
    %16 = vector.load %arg7[%c0_13, %c0_14] : memref<1x64xf32, #tpu.memory_space<vmem>>, vector<1x64xf32>
    %17 = vector.broadcast %16 : vector<1x64xf32> to vector<8x64xf32>
    %18 = arith.addf %15, %17 : vector<8x64xf32>
    %cst_15 = arith.constant 0.000000e+00 : f32
    %19 = vector.broadcast %cst_15 : f32 to vector<8x64xf32>
    %20 = arith.maximumf %18, %19 : vector<8x64xf32>
    %c0_16 = arith.constant 0 : index
    %c0_17 = arith.constant 0 : index
    %21 = vector.load %arg8[%c0_16, %c0_17] : memref<1x64xf32, #tpu.memory_space<vmem>>, vector<1x64xf32>
    %22 = vector.broadcast %21 : vector<1x64xf32> to vector<8x64xf32>
    %23 = arith.mulf %20, %22 : vector<8x64xf32>
    %c0_18 = arith.constant 0 : index
    %c0_19 = arith.constant 0 : index
    %24 = vector.load %arg9[%c0_18, %c0_19] : memref<1x64xf32, #tpu.memory_space<vmem>>, vector<1x64xf32>
    %25 = vector.broadcast %24 : vector<1x64xf32> to vector<8x64xf32>
    %26 = arith.addf %23, %25 : vector<8x64xf32>
    %c0_20 = arith.constant 0 : index
    %c0_21 = arith.constant 0 : index
    %27 = vector.load %arg10[%c0_20, %c0_21] : memref<1x64xf32, #tpu.memory_space<vmem>>, vector<1x64xf32>
    %cst_22 = arith.constant dense<0.000000e+00> : vector<1x8xf32>
    %28 = tpu.matmul %27, %26, %cst_22 {dimension_numbers = #tpu.dot_dimension_numbers<[1], [1], [0], [0], [0, 0, 1, 0], [], []>} : vector<1x64xf32>, vector<8x64xf32>, vector<1x8xf32> -> vector<1x8xf32>
    %c0_23 = arith.constant 0 : index
    %c0_24 = arith.constant 0 : index
    %29 = vector.load %arg11[%c0_23, %c0_24] : memref<1x1xf32, #tpu.memory_space<vmem>>, vector<1x1xf32>
    %30 = vector.broadcast %29 : vector<1x1xf32> to vector<1x8xf32>
    %31 = arith.addf %28, %30 : vector<1x8xf32>
    %cst_25 = arith.constant 0.000000e+00 : f32
    %32 = vector.broadcast %cst_25 : f32 to vector<1x8xf32>
    %33 = arith.subf %32, %31 : vector<1x8xf32>
    %34 = math.exp %33 : vector<1x8xf32>
    %cst_26 = arith.constant 1.000000e+00 : f32
    %35 = vector.broadcast %cst_26 : f32 to vector<1x8xf32>
    %36 = arith.addf %35, %34 : vector<1x8xf32>
    %37 = tpu.reciprocal %36 : vector<1x8xf32> -> vector<1x8xf32>
    %38 = vector.shape_cast %37 : vector<1x8xf32> to vector<1x1x8xf32>
    %c0_27 = arith.constant 0 : index
    %c0_28 = arith.constant 0 : index
    %c0_29 = arith.constant 0 : index
    %39 = vector.load %arg12[%c0_27, %c0_28, %c0_29] : memref<1x1x8xf32, #tpu.memory_space<vmem>>, vector<1x1x8xf32>
    tpu.vector_store %arg12[%c0_27, %c0_28, %c0_29], %38 {strides = array<i32>} : memref<1x1x8xf32, #tpu.memory_space<vmem>>, vector<1x1x8xf32>,
    return
  }
  func.func @transform_0(%arg0: i32) -> (i32, i32) {
    %c0_i32 = arith.constant 0 : i32
    %c0_i32_0 = arith.constant 0 : i32
    return %arg0, %c0_i32 : i32, i32
  }
  func.func @transform_1(%arg0: i32) -> (i32, i32) {
    %c0_i32 = arith.constant 0 : i32
    %c0_i32_0 = arith.constant 0 : i32
    %c0_i32_1 = arith.constant 0 : i32
    return %c0_i32, %c0_i32_0 : i32, i32
  }
  func.func @transform_2(%arg0: i32) -> (i32, i32) {
    %c0_i32 = arith.constant 0 : i32
    %c0_i32_0 = arith.constant 0 : i32
    %c0_i32_1 = arith.constant 0 : i32
    return %c0_i32, %c0_i32_0 : i32, i32
  }
  func.func @transform_3(%arg0: i32) -> (i32, i32) {
    %c0_i32 = arith.constant 0 : i32
    %c0_i32_0 = arith.constant 0 : i32
    %c0_i32_1 = arith.constant 0 : i32
    return %c0_i32, %c0_i32_0 : i32, i32
  }
  func.func @transform_4(%arg0: i32) -> (i32, i32) {
    %c0_i32 = arith.constant 0 : i32
    %c0_i32_0 = arith.constant 0 : i32
    %c0_i32_1 = arith.constant 0 : i32
    return %c0_i32, %c0_i32_0 : i32, i32
  }
  func.func @transform_5(%arg0: i32) -> (i32, i32) {
    %c0_i32 = arith.constant 0 : i32
    %c0_i32_0 = arith.constant 0 : i32
    %c0_i32_1 = arith.constant 0 : i32
    return %c0_i32, %c0_i32_0 : i32, i32
  }
  func.func @transform_6(%arg0: i32) -> (i32, i32) {
    %c0_i32 = arith.constant 0 : i32
    %c0_i32_0 = arith.constant 0 : i32
    %c0_i32_1 = arith.constant 0 : i32
    return %c0_i32, %c0_i32_0 : i32, i32
  }
  func.func @transform_7(%arg0: i32) -> (i32, i32) {
    %c0_i32 = arith.constant 0 : i32
    %c0_i32_0 = arith.constant 0 : i32
    %c0_i32_1 = arith.constant 0 : i32
    return %c0_i32, %c0_i32_0 : i32, i32
  }
  func.func @transform_8(%arg0: i32) -> (i32, i32) {
    %c0_i32 = arith.constant 0 : i32
    %c0_i32_0 = arith.constant 0 : i32
    %c0_i32_1 = arith.constant 0 : i32
    return %c0_i32, %c0_i32_0 : i32, i32
  }
  func.func @transform_9(%arg0: i32) -> (i32, i32) {
    %c0_i32 = arith.constant 0 : i32
    %c0_i32_0 = arith.constant 0 : i32
    %c0_i32_1 = arith.constant 0 : i32
    return %c0_i32, %c0_i32_0 : i32, i32
  }
  func.func @transform_10(%arg0: i32) -> (i32, i32) {
    %c0_i32 = arith.constant 0 : i32
    %c0_i32_0 = arith.constant 0 : i32
    %c0_i32_1 = arith.constant 0 : i32
    return %c0_i32, %c0_i32_0 : i32, i32
  }
  func.func @transform_11(%arg0: i32) -> (i32, i32, i32) {
    %c0_i32 = arith.constant 0 : i32
    %c0_i32_0 = arith.constant 0 : i32
    %c0_i32_1 = arith.constant 0 : i32
    return %arg0, %c0_i32, %c0_i32_0 : i32, i32, i32
  }
}

</mosaic_0001>

<bundles_post_ra>
// kernel: fraudnet_forward.3
= control target key start
LH: loop header
LB: loop body
LE: loop exit
PB: predicated region body
PF: predicated region fallthrough
CT: control target
= control target key end

     0   :  { %10 = vsyncpa [#allocation3], 0  ;;  %s210_s15 = smov [#allocation2]   ;;  %s284_s0 = inlined_call_operand.hbm [shape: f32[8,32], index: 0, kind: input, shape index: {}]   ;;  %s285_s1 = inlined_call_operand.vmem [shape: f32[32,128], index: 1, kind: input, shape index: {}]   ;;  %s286_s2 = inlined_call_operand.vmem [shape: f32[1,128], index: 2, kind: input, shape index: {}]   ;;  %s287_s3 = inlined_call_operand.vmem [shape: f32[1,128], index: 3, kind: output, shape index: {0}]   ;;  %s288_s4 = inlined_call_operand.vmem [shape: f32[1,128], index: 4, kind: output, shape index: {1}]  }
   0x1   :  { %s17_s16 = sshll.u32 %s210_s15, 4  ;;  %s186_s19 = scalar_lea.hbm %s284_s0, 128  ;;  %s18_s16 = int_to_ptr.vmem [resolvable:$true] %s17_s16 }
   0x2   :  { %p187_p0 = scmp.ne.s32.totalorder %s284_s0, %s186_s19  ;;  %p190_p1 = scmp.lt.u32.totalorder %s186_s19, %s284_s0 }
   0x4   :  { %p192_p2 = pnand %p190_p1, %p187_p0 }
   0x6   :  { %195 = shalt.err (!%p192_p2)
}
   0x7   :  { %s196_s24 = scalar_lea.vmem %s18_s16, 128  ;;  %p201_p4 = scmp.lt.s32.totalorder %s18_s16, %s18_s16 }
   0x8   :  { %p197_p3 = scmp.ne.s32.totalorder %s18_s16, %s196_s24  ;;  %p202_p5 = scmp.lt.s32.totalorder %s196_s24, %s196_s24 }
   0xa   :  { %p203_p6 = por %p202_p5, %p201_p4 }
   0xc   :  { %p204_p7 = pnand %p203_p6, %p197_p3 }
   0xe   :  { %207 = shalt.err (!%p204_p7)
}
   0xf   :  { %20 = dma.hbm_to_vmem [thread:$0]  %s284_s0, 128, %s18_s16, [#allocation3]  }
  0x10   :  { %208 = dma.done.wait [#allocation3], 128  }
  0x11   :  { %209 = vsyncadd [#allocation3], 4294967168  ;;  %v211_v0 = vmov 0.0|0.0   ;;  %v212_v1 = vmov 0.0   ;;  %vm213_vm0 = vmmov 0   ;;  %v35_v2 = vld [vmem:[%s285_s1] sm:$0xff] }
  0x12   :  { %176 = vmatprep.subr.bf16.mxu0 %v211_v0  ;;  %32 = vst [vmem:[%s287_s3] sm:$0x1] %v212_v1  ;;  %33 = vst [vmem:[%s288_s4] sm:$0x1] %v212_v1  ;;  %173 = vmatprep.mubr.msk.f32.mxu0 %vm213_vm0, %v212_v1  ;;  %v36_v3 = vld [vmem:[%s285_s1 + $0x8] sm:$0xff]  ;;  %v37_v4 = vld [vmem:[%s285_s1 + $0x10] sm:$0xff]  ;;  %vm46_vm1 = vcmask 261120  }
  0x13   :  { %v177_v5 = vpack.c.bf16 %v36_v3, %v35_v2  ;;  %v38_v6 = vld [vmem:[%s285_s1 + $0x18] sm:$0xff]  ;;  %v34_v8 = vld [vmem:[#allocation2] sm:$0xff] }
  0x14   :  { %v180_v7 = vpack.c.bf16 %v38_v6, %v37_v4  ;;  %v158_v9 = vld [vmem:[%s286_s2] ss:$0 sm:$0xff] }
  0x15   :  { %178 = vmatpush3.bf16.msra.mxu0 %v177_v5 }
  0x16   :  { %179 = vmatprep.subr.bf16.mxu0 %v211_v0 }
  0x19   :  { %181 = vmatpush3.bf16.msra.mxu0 %v180_v7  ;;  %v130_v24 = vld [vmem:[%s287_s3] sm:$0x1] }
  0x1a   :  { %v139_v27 = vld [vmem:[%s288_s4] sm:$0x1] }
  0x1c   :  { %174 = vmatmul.mubr.msk.f32.vlgmr.msra.gmra.mrb[0].mxu0 %vm46_vm1, %v34_v8 }
  0xef   :  { %v116_v10 = vpop.f32.mrb[0].mxu0 }
  0xf0   :  { %v117_v11 = vadd.f32 %v158_v9, %v116_v10  ;;  %v175_v12 = vpop.f32.mrb[1].mxu0 }
  0xf2   :  { %v120_v13 = vmax.f32 %v117_v11, 0.0 }
  0xf4   :  { %v131_v14 = vrot.slane %v120_v13, 4  ;;  %v140_v15 = vmul.f32 %v120_v13, %v120_v13 }
  0xf6   :  { %v132_v16 = vadd.f32 %v131_v14, %v120_v13  ;;  %v141_v17 = vrot.slane %v140_v15, 4 }
  0xf8   :  { %v133_v18 = vrot.slane %v132_v16, 2  ;;  %v142_v19 = vadd.f32 %v141_v17, %v140_v15 }
  0xfa   :  { %v134_v20 = vadd.f32 %v133_v18, %v132_v16  ;;  %v143_v21 = vrot.slane %v142_v19, 2 }
  0xfc   :  { %v135_v22 = vrot.slane %v134_v20, 1  ;;  %v144_v23 = vadd.f32 %v143_v21, %v142_v19 }
  0xfe   :  { %v136_v25 = vadd.f32 %v135_v22, %v134_v20  ;;  %v145_v26 = vrot.slane %v144_v23, 1 }
 0x100   :  { %v137_v28 = vadd.f32 %v136_v25, %v130_v24  ;;  %v146_v29 = vadd.f32 %v145_v26, %v144_v23 }
 0x102   :  { %138 = vst [vmem:[%s287_s3] sm:$0x1] %v137_v28  ;;  %v147_v30 = vadd.f32 %v146_v29, %v139_v27 }
 0x104   :  { %148 = vst [vmem:[%s288_s4] sm:$0x1] %v147_v30 }
 0x105   :  { %157 = vsyncpa [#allocation3], 1 }

// kernel: fraudnet_forward.4
= control target key start
LH: loop header
LB: loop body
LE: loop exit
PB: predicated region body
PF: predicated region fallthrough
CT: control target
= control target key end

     0   :  { %vm32_vm0 = vcmask 516096   ;;  %v378_v0 = vmov 0.0|0.0   ;;  %v379_v4 = vmov 0.0   ;;  %vm380_vm1 = vmmov 0   ;;  %s523_s1 = inlined_call_operand.vmem [shape: f32[32,128], index: 1, kind: input, shape index: {}]   ;;  %s524_s7 = inlined_call_operand.vmem [shape: f32[1,64], index: 7, kind: output, shape index: {0}]   ;;  %s525_s8 = inlined_call_operand.vmem [shape: f32[1,64], index: 8, kind: output, shape index: {1}]   ;;  %s526_s5 = inlined_call_operand.vmem [shape: f32[128,64], index: 5, kind: input, shape index: {}]   ;;  %s527_s0 = inlined_call_operand.vmem [shape: f32[8,32], index: 0, kind: input, shape index: {}]   ;;  %s528_s2 = inlined_call_operand.vmem [shape: f32[1,128], index: 2, kind: input, shape index: {}]   ;;  %s529_s3 = inlined_call_operand.vmem [shape: f32[1,128], index: 3, kind: input, shape index: {}]   ;;  %s530_s4 = inlined_call_operand.vmem [shape: f32[1,128], index: 4, kind: input, shape index: {}]   ;;  %s531_s6 = inlined_call_operand.vmem [shape: f32[1,64], index: 6, kind: input, shape index: {}]  }
   0x1   :  { %345 = vmatprep.subr.bf16.mxu0 %v378_v0  ;;  %v36_v1 = vld [vmem:[%s523_s1] sm:$0xff]  ;;  %v37_v2 = vld [vmem:[%s523_s1 + $0x8] sm:$0xff]  ;;  %v38_v3 = vld [vmem:[%s523_s1 + $0x10] sm:$0xff]  ;;  %33 = vst.msk [vmem:[%s524_s7] sm:$0x1] %vm32_vm0, %v379_v4  ;;  %307 = vmatprep.mubr.msk.f32.mxu0 %vm380_vm1, %v379_v4  ;;  %vm47_vm2 = vcmask 261120  }
   0x2   :  { %34 = vst.msk [vmem:[%s525_s8] sm:$0x1] %vm32_vm0, %v379_v4  ;;  %v346_v5 = vpack.c.bf16 %v37_v2, %v36_v1  ;;  %v39_v6 = vld [vmem:[%s523_s1 + $0x18] sm:$0xff]  ;;  %351 = vmatprep.subr.bf16.mxu1 %v378_v0  ;;  %v138_v7 = vld [vmem:[%s526_s5] sm:$0xff]  ;;  %342 = vmatprep.mubr.msk.f32.mxu1 %vm380_vm1, %v379_v4  ;;  %v139_v8 = vld [vmem:[%s526_s5 + $0x8] sm:$0xff]  ;;  %vm242_vm3 = vcmask 523264  }
   0x3   :  { %v140_v9 = vld [vmem:[%s526_s5 + $0x10] sm:$0xff]  ;;  %v141_v10 = vld [vmem:[%s526_s5 + $0x18] sm:$0xff]  ;;  %v349_v11 = vpack.c.bf16 %v39_v6, %v38_v3  ;;  %v352_v12 = vpack.c.bf16 %v139_v8, %v138_v7  ;;  %v142_v14 = vld [vmem:[%s526_s5 + $0x20] sm:$0xff] }
   0x4   :  { %347 = vmatpush3.bf16.msra.mxu0 %v346_v5  ;;  %v355_v13 = vpack.c.bf16 %v141_v10, %v140_v9  ;;  %v143_v15 = vld [vmem:[%s526_s5 + $0x28] sm:$0xff]  ;;  %v35_v16 = vld [vmem:[%s527_s0] sm:$0xff]  ;;  %v144_v18 = vld [vmem:[%s526_s5 + $0x30] sm:$0xff] }
   0x5   :  { %348 = vmatprep.subr.bf16.mxu0 %v378_v0  ;;  %353 = vmatpush3.bf16.msra.mxu1 %v352_v12  ;;  %v358_v17 = vpack.c.bf16 %v143_v15, %v142_v14  ;;  %v145_v19 = vld [vmem:[%s526_s5 + $0x38] sm:$0xff]  ;;  %v146_v21 = vld [vmem:[%s526_s5 + $0x40] sm:$0xff]  ;;  %v147_v22 = vld [vmem:[%s526_s5 + $0x48] sm:$0xff] }
   0x6   :  { %354 = vmatprep.subr.bf16.mxu1 %v378_v0  ;;  %v361_v20 = vpack.c.bf16 %v145_v19, %v144_v18  ;;  %v364_v23 = vpack.c.bf16 %v147_v22, %v146_v21  ;;  %v148_v24 = vld [vmem:[%s526_s5 + $0x50] sm:$0xff]  ;;  %v149_v25 = vld [vmem:[%s526_s5 + $0x58] sm:$0xff]  ;;  %v150_v27 = vld [vmem:[%s526_s5 + $0x60] sm:$0xff] }
   0x7   :  { %v367_v26 = vpack.c.bf16 %v149_v25, %v148_v24  ;;  %v151_v28 = vld [vmem:[%s526_s5 + $0x68] sm:$0xff]  ;;  %v152_v30 = vld [vmem:[%s526_s5 + $0x70] sm:$0xff]  ;;  %v153_v31 = vld [vmem:[%s526_s5 + $0x78] sm:$0xff] }
   0x8   :  { %350 = vmatpush3.bf16.msra.mxu0 %v349_v11  ;;  %v370_v29 = vpack.c.bf16 %v151_v28, %v150_v27  ;;  %v373_v32 = vpack.c.bf16 %v153_v31, %v152_v30  ;;  %v272_v33 = vld [vmem:[%s528_s2] ss:$0 sm:$0xff] }
   0x9   :  { %356 = vmatpush3.bf16.msra.mxu1 %v355_v13  ;;  %v274_v37 = vld [vmem:[%s529_s3] ss:$0 sm:$0xff] }
   0xa   :  { %357 = vmatprep.subr.bf16.mxu1 %v378_v0  ;;  %v275_v39 = vld [vmem:[%s530_s4] ss:$0 sm:$0xff] }
   0xb   :  { %308 = vmatmul.mubr.msk.f32.vlgmr.msra.gmra.mrb[0].mxu0 %vm47_vm2, %v35_v16  ;;  %v276_v42 = vld [vmem:[%s531_s6] ss:$0 sm:$0xff] }
   0xc   :  { %v241_v59 = vld [vmem:[%s524_s7] sm:$0x1] }
   0xd   :  { %359 = vmatpush3.bf16.msra.mxu1 %v358_v17  ;;  %v253_v62 = vld [vmem:[%s525_s8] sm:$0x1] }
   0xe   :  { %360 = vmatprep.subr.bf16.mxu1 %v378_v0 }
  0x11   :  { %362 = vmatpush3.bf16.msra.mxu1 %v361_v20 }
  0x12   :  { %363 = vmatprep.subr.bf16.mxu1 %v378_v0 }
  0x15   :  { %365 = vmatpush3.bf16.msra.mxu1 %v364_v23 }
  0x16   :  { %366 = vmatprep.subr.bf16.mxu1 %v378_v0 }
  0x19   :  { %368 = vmatpush3.bf16.msra.mxu1 %v367_v26 }
  0x1a   :  { %369 = vmatprep.subr.bf16.mxu1 %v378_v0 }
  0x1d   :  { %371 = vmatpush3.bf16.msra.mxu1 %v370_v29 }
  0x1e   :  { %372 = vmatprep.subr.bf16.mxu1 %v378_v0 }
  0x21   :  { %374 = vmatpush3.bf16.msra.mxu1 %v373_v32 }
  0xde   :  { %v117_v34 = vpop.f32.mrb[0].mxu0 }
  0xdf   :  { %v118_v35 = vadd.f32 %v272_v33, %v117_v34  ;;  %v309_v36 = vpop.f32.mrb[1].mxu0 }
  0xe1   :  { %v121_v38 = vmax.f32 %v118_v35, 0.0 }
  0xe3   :  { %v129_v40 = vmul.f32 %v274_v37, %v121_v38 }
  0xe5   :  { %v137_v41 = vadd.f32 %v275_v39, %v129_v40 }
  0xe7   :  { %343 = vmatmul.mubr.f32.vlgmr.msra.gmra.mrb[0].mxu1 %v137_v41 }
 0x1ba   :  { %v227_v43 = vpop.f32.mrb[0].mxu1 }
 0x1bb   :  { %v228_v44 = vadd.f32 %v276_v42, %v227_v43  ;;  %v344_v45 = vpop.f32.mrb[1].mxu1 }
 0x1bd   :  { %v231_v46 = vmax.f32 %v228_v44, 0.0 }
 0x1bf   :  { %v243_v47 = vsel %vm242_vm3, %v231_v46, 0.0  ;;  %v254_v48 = vmul.f32 %v231_v46, %v231_v46 }
 0x1c0   :  { %v244_v49 = vrot.slane %v243_v47, 4 }
 0x1c1   :  { %v255_v50 = vsel %vm242_vm3, %v254_v48, 0.0 }
 0x1c2   :  { %v245_v51 = vadd.f32 %v244_v49, %v243_v47  ;;  %v256_v52 = vrot.slane %v255_v50, 4 }
 0x1c4   :  { %v246_v53 = vrot.slane %v245_v51, 2  ;;  %v257_v54 = vadd.f32 %v256_v52, %v255_v50 }
 0x1c6   :  { %v247_v55 = vadd.f32 %v246_v53, %v245_v51  ;;  %v258_v56 = vrot.slane %v257_v54, 2 }
 0x1c8   :  { %v248_v57 = vrot.slane %v247_v55, 1  ;;  %v259_v58 = vadd.f32 %v258_v56, %v257_v54 }
 0x1ca   :  { %v249_v60 = vadd.f32 %v248_v57, %v247_v55  ;;  %v260_v61 = vrot.slane %v259_v58, 1 }
 0x1cc   :  { %v250_v63 = vadd.f32 %v249_v60, %v241_v59  ;;  %v261_v0 = vadd.f32 %v260_v61, %v259_v58 }
 0x1ce   :  { %252 = vst.msk [vmem:[%s524_s7] sm:$0x1] %vm32_vm0, %v250_v63  ;;  %v262_v1 = vadd.f32 %v261_v0, %v253_v62 }
 0x1d0   :  { %263 = vst.msk [vmem:[%s525_s8] sm:$0x1] %vm32_vm0, %v262_v1 }

// kernel: fraudnet_forward.5
= control target key start
LH: loop header
LB: loop body
LE: loop exit
PB: predicated region body
PF: predicated region fallthrough
CT: control target
= control target key end

     0   :  { %s678_s0 = inlined_call_operand.vmem [shape: f32[8,32], index: 0, kind: input, shape index: {}]   ;;  %s679_s1 = inlined_call_operand.vmem [shape: f32[32,128], index: 1, kind: input, shape index: {}]   ;;  %s680_s2 = inlined_call_operand.vmem [shape: f32[1,128], index: 2, kind: input, shape index: {}]   ;;  %s681_s3 = inlined_call_operand.vmem [shape: f32[1,128], index: 3, kind: input, shape index: {}]   ;;  %s682_s4 = inlined_call_operand.vmem [shape: f32[1,128], index: 4, kind: input, shape index: {}]   ;;  %s683_s5 = inlined_call_operand.vmem [shape: f32[128,64], index: 5, kind: input, shape index: {}]   ;;  %s684_s6 = inlined_call_operand.vmem [shape: f32[1,64], index: 6, kind: input, shape index: {}]   ;;  %s685_s7 = inlined_call_operand.vmem [shape: f32[1,64], index: 7, kind: input, shape index: {}]   ;;  %s686_s8 = inlined_call_operand.vmem [shape: f32[1,64], index: 8, kind: input, shape index: {}]   ;;  %s687_s9 = inlined_call_operand.vmem [shape: f32[1,64], index: 9, kind: input, shape index: {}]   ;;  %s688_s10 = inlined_call_operand.<no memory space> [shape: f32[1,1], index: 10, kind: input, shape index: {}]   ;;  %s689_s11 = inlined_call_operand.hbm [shape: f32[1,1,8], index: 11, kind: output, shape index: {}]  }
   0x1   :  { %v16_v0 = vstv %s688_s10 }
   0x2   :  { %17 = vst [vmem:[#allocation2] sm:$0x1] %v16_v0 }
   0x3   :  { %v42_v1 = vld [vmem:[%s679_s1] sm:$0xff]  ;;  %v43_v2 = vld [vmem:[%s679_s1 + $0x8] sm:$0xff]  ;;  %v44_v3 = vld [vmem:[%s679_s1 + $0x10] sm:$0xff]  ;;  %v511_v4 = vmov 0.0|0.0   ;;  %vm512_vm0 = vmmov 0   ;;  %v513_v7 = vmov 0.0  }
   0x4   :  { %447 = vmatprep.subr.bf16.mxu0 %v511_v4  ;;  %v448_v5 = vpack.c.bf16 %v43_v2, %v42_v1  ;;  %v45_v6 = vld [vmem:[%s679_s1 + $0x18] sm:$0xff]  ;;  %404 = vmatprep.mubr.msk.f32.mxu0 %vm512_vm0, %v513_v7  ;;  %v144_v8 = vld [vmem:[%s683_s5] sm:$0xff]  ;;  %v145_v9 = vld [vmem:[%s683_s5 + $0x8] sm:$0xff] }
   0x5   :  { %453 = vmatprep.subr.bf16.mxu1 %v511_v4  ;;  %v146_v10 = vld [vmem:[%s683_s5 + $0x10] sm:$0xff]  ;;  %v147_v11 = vld [vmem:[%s683_s5 + $0x18] sm:$0xff]  ;;  %439 = vmatprep.mubr.msk.f32.mxu1 %vm512_vm0, %v513_v7  ;;  %v451_v12 = vpack.c.bf16 %v45_v6, %v44_v3  ;;  %v454_v13 = vpack.c.bf16 %v145_v9, %v144_v8  ;;  %v148_v15 = vld [vmem:[%s683_s5 + $0x20] sm:$0xff] }
   0x6   :  { %449 = vmatpush3.bf16.msra.mxu0 %v448_v5  ;;  %v457_v14 = vpack.c.bf16 %v147_v11, %v146_v10  ;;  %v149_v16 = vld [vmem:[%s683_s5 + $0x28] sm:$0xff] }
   0x7   :  { %450 = vmatprep.subr.bf16.mxu0 %v511_v4  ;;  %455 = vmatpush3.bf16.msra.mxu1 %v454_v13 }
   0x8   :  { %456 = vmatprep.subr.bf16.mxu1 %v511_v4 }
   0x9   :  { %18 = vsyncpa [#allocation4], 0  ;;  %v41_v17 = vld [vmem:[%s678_s0] sm:$0xff]  ;;  %vm53_vm1 = vcmask 261120   ;;  %v460_v18 = vpack.c.bf16 %v149_v16, %v148_v15  ;;  %v150_v19 = vld [vmem:[%s683_s5 + $0x30] sm:$0xff]  ;;  %v514_v44 = vmov 0   ;;  %v261_v55 = vlaneseq }
   0xa   :  { %452 = vmatpush3.bf16.msra.mxu0 %v451_v12  ;;  %v151_v20 = vld [vmem:[%s683_s5 + $0x38] sm:$0xff]  ;;  %v152_v22 = vld [vmem:[%s683_s5 + $0x40] sm:$0xff]  ;;  %v153_v23 = vld [vmem:[%s683_s5 + $0x48] sm:$0xff]  ;;  %482 = vset.pattern.permute.xlu0 %v514_v44  ;;  %vm265_vm2 = vcmask 523264   ;;  %vm347_vm3 = vcmask 57344  }
   0xb   :  { %442 = vmatprep.subr.mxu0 %v513_v7  ;;  %458 = vmatpush3.bf16.msra.mxu1 %v457_v14  ;;  %v463_v21 = vpack.c.bf16 %v151_v20, %v150_v19  ;;  %v466_v24 = vpack.c.bf16 %v153_v23, %v152_v22  ;;  %v154_v25 = vld [vmem:[%s683_s5 + $0x50] sm:$0xff]  ;;  %v155_v26 = vld [vmem:[%s683_s5 + $0x58] sm:$0xff]  ;;  %v156_v28 = vld [vmem:[%s683_s5 + $0x60] sm:$0xff]  ;;  %v262_v56 = vshrl.u32 %v261_v55, 7 }
   0xc   :  { %459 = vmatprep.subr.bf16.mxu1 %v511_v4  ;;  %v469_v27 = vpack.c.bf16 %v155_v26, %v154_v25  ;;  %v157_v29 = vld [vmem:[%s683_s5 + $0x68] sm:$0xff]  ;;  %v158_v31 = vld [vmem:[%s683_s5 + $0x70] sm:$0xff]  ;;  %v159_v32 = vld [vmem:[%s683_s5 + $0x78] sm:$0xff] }
   0xd   :  { %405 = vmatmul.mubr.msk.f32.vlgmr.msra.gmra.mrb[0].mxu0 %vm53_vm1, %v41_v17  ;;  %v472_v30 = vpack.c.bf16 %v157_v29, %v156_v28  ;;  %v475_v33 = vpack.c.bf16 %v159_v32, %v158_v31  ;;  %v363_v34 = vld [vmem:[%s680_s2] ss:$0 sm:$0xff]  ;;  %v263_v57 = vsub.s32 0, %v262_v56 }
   0xe   :  { %444 = vmatprep.mubr.msk.f32.mxu0 %vm512_vm0, %v513_v7  ;;  %v365_v38 = vld [vmem:[%s681_s3] ss:$0 sm:$0xff] }
   0xf   :  { %461 = vmatpush3.bf16.msra.mxu1 %v460_v18  ;;  %v366_v40 = vld [vmem:[%s682_s4] ss:$0 sm:$0xff] }
  0x10   :  { %462 = vmatprep.subr.bf16.mxu1 %v511_v4  ;;  %v255_v43 = vld [vmem:[#allocation2] sm:$0x1] }
  0x11   :  { %258 = vperm.xlu0 %482, %v255_v43   ;;  %v367_v45 = vld [vmem:[%s684_s6] ss:$0 sm:$0xff]  ;;  %s515_s6 = smov [#allocation3]  }
  0x12   :  { %v368_v49 = vld [vmem:[%s685_s7] ss:$0 sm:$0xff]  ;;  %s355_s7 = sshll.u32 %s515_s6, 4  ;;  %s356_s7 = int_to_ptr.vmem [resolvable:$true] %s355_s7 }
  0x13   :  { %464 = vmatpush3.bf16.msra.mxu1 %v463_v21  ;;  %v369_v51 = vld [vmem:[%s686_s8] ss:$0 sm:$0xff]  ;;  %s487_s8 = scalar_lea.vmem %s356_s7, 16  ;;  %p492_p1 = scmp.lt.s32.totalorder %s356_s7, %s356_s7 }
  0x14   :  { %465 = vmatprep.subr.bf16.mxu1 %v511_v4  ;;  %v254_v54 = vld [vmem:[%s687_s9] sm:$0x1]  ;;  %p488_p0 = scmp.ne.s32.totalorder %s356_s7, %s487_s8  ;;  %s491_s9 = scalar_lea.vmem %s356_s7, 32 }
  0x15   :  { %p493_p2 = scmp.lt.s32.totalorder %s491_s9, %s487_s8 }
  0x17   :  { %467 = vmatpush3.bf16.msra.mxu1 %v466_v24  ;;  %p494_p3 = por %p493_p2, %p492_p1 }
  0x18   :  { %468 = vmatprep.subr.bf16.mxu1 %v511_v4 }
  0x19   :  { %p495_p4 = pnand %p494_p3, %p488_p0 }
  0x1b   :  { %470 = vmatpush3.bf16.msra.mxu1 %v469_v27 }
  0x1c   :  { %471 = vmatprep.subr.bf16.mxu1 %v511_v4 }
  0x1f   :  { %473 = vmatpush3.bf16.msra.mxu1 %v472_v30 }
  0x20   :  { %474 = vmatprep.subr.bf16.mxu1 %v511_v4 }
  0x23   :  { %476 = vmatpush3.bf16.msra.mxu1 %v475_v33 }
  0x90   :  { %v259_v58 = vpop.permute.xlu0 %258 }
  0x91   :  { %v264_v59 = vrot.slane %v259_v58, %v263_v57 }
  0xe0   :  { %v123_v35 = vpop.f32.mrb[0].mxu0 }
  0xe1   :  { %v124_v36 = vadd.f32 %v363_v34, %v123_v35  ;;  %v406_v37 = vpop.f32.mrb[1].mxu0 }
  0xe3   :  { %v127_v39 = vmax.f32 %v124_v36, 0.0 }
  0xe5   :  { %v135_v41 = vmul.f32 %v365_v38, %v127_v39 }
  0xe7   :  { %v143_v42 = vadd.f32 %v366_v40, %v135_v41 }
  0xe9   :  { %440 = vmatmul.mubr.f32.vlgmr.msra.gmra.mrb[0].mxu1 %v143_v42 }
 0x1bc   :  { %v233_v46 = vpop.f32.mrb[0].mxu1 }
 0x1bd   :  { %v234_v47 = vadd.f32 %v367_v45, %v233_v46  ;;  %v441_v48 = vpop.f32.mrb[1].mxu1 }
 0x1bf   :  { %v237_v50 = vmax.f32 %v234_v47, 0.0 }
 0x1c1   :  { %v245_v52 = vmul.f32 %v368_v49, %v237_v50 }
 0x1c3   :  { %v253_v53 = vadd.f32 %v369_v51, %v245_v52 }
 0x1c5   :  { %443 = vmatpush3.xpose.msk.msra.mxu0 %vm265_vm2, %v253_v53 }
 0x1c8   :  { %445 = vmatmul.mubr.msk.f32.vlgmr.msra.gmra.mrb[2].mxu0 %vm265_vm2, %v254_v54 }
 0x29b   :  { %v338_v60 = vpop.f32.mrb[2].mxu0 }
 0x29c   :  { %v339_v61 = vadd.f32 %v338_v60, %v264_v59  ;;  %v446_v62 = vpop.f32.mrb[3].mxu0 }
 0x29e   :  { %v342_v63 = vsub.f32 0.0, %v339_v61 }
 0x2a0   :  { %v343_v0 = vmul.f32 1.442695, %v342_v63 }
 0x2a2   :  { %483 = vpow2.f32 %v343_v0 }
 0x2ac   :  { %v484_v1 = vpop.eup %483 }
 0x2ad   :  { %v345_v2 = vadd.f32 1.0, %v484_v1 }
 0x2af   :  { %485 = vrcp.f32 %v345_v2 }
 0x2b9   :  { %v486_v3 = vpop.eup %485 }
 0x2ba   :  { %348 = vst.msk [vmem:[#allocation3] sm:$0x1] %vm347_vm3, %v486_v3 }
 0x2bb   :  { %498 = shalt.err (!%p495_p4)
}
 0x2bc   :  { %s499_s28 = scalar_lea.hbm %s689_s11, 16 }
 0x2bd   :  { %p500_p5 = scmp.ne.s32.totalorder %s689_s11, %s499_s28  ;;  %p503_p6 = scmp.lt.u32.totalorder %s499_s28, %s689_s11 }
 0x2bf   :  { %p505_p7 = pnand %p503_p6, %p500_p5 }
 0x2c1   :  { %508 = shalt.err (!%p505_p7)
}
 0x2c2   :  { %358 = dma.vmem_to_hbm [thread:$0]  %s356_s7, 16, %s689_s11, [#allocation4]  }
 0x2c3   :  { %509 = dma.done.wait [#allocation4], 16  }
 0x2c4   :  { %510 = vsyncadd [#allocation4], 4294967280 }
 0x2c5   :  { %362 = vsyncpa [#allocation4], 1 }

</bundles_post_ra>
